<compile_context>
chip_gen: v5e
topology: v5e:2x2
jax: 0.10.0
libtpu: 0.0.40
codegen_flags: <defaults>
</compile_context>

<pallas_src>
import functools

import jax
import jax.numpy as jnp
from jax import lax
from jax.experimental import pallas as pl
from jax.experimental.pallas import tpu as pltpu

F32 = jnp.float32
BF16 = jnp.bfloat16
_EPS_LN = 1e-5
_EPS_BN = 1e-5


# --------------------------------------------------------------------------------------
# helpers
# --------------------------------------------------------------------------------------
def _round_up(x, m):
    return ((x + m - 1) // m) * m


def _cparams(n_axes):
    return pltpu.CompilerParams(dimension_semantics=("parallel",) * n_axes)


def _ln(x, g, b, eps):
    """LayerNorm on an f32 [rows, F] value; g/b are [1, F] f32."""
    mean = jnp.mean(x, axis=-1, keepdims=True)
    xc = x - mean
    var = jnp.mean(xc * xc, axis=-1, keepdims=True)
    return xc * jax.lax.rsqrt(var + eps) * g + b


def _pad_rows(x2d, bm):
    M = x2d.shape[0]
    Mp = _round_up(M, bm)
    if Mp == M:
        return x2d, M, Mp
    return jnp.pad(x2d, ((0, Mp - M), (0, 0))), M, Mp


# --------------------------------------------------------------------------------------
# Pallas kernels
# --------------------------------------------------------------------------------------
def _linear_kernel(x_ref, w_ref, b_ref, o_ref):
    y = jnp.dot(x_ref[...].astype(BF16), w_ref[...], preferred_element_type=jnp.float32)
    o_ref[...] = (y + b_ref[...]).astype(o_ref.dtype)


def linear(x2d, w, b, bm_max=512):
    """Row-tiled y = x @ w + b (frontend projection).  w is bf16, b is [1, N] f32."""
    M, K = x2d.shape
    _, N = w.shape
    bm = min(bm_max, _round_up(M, 8))
    xp, M, Mp = _pad_rows(x2d, bm)
    out = pl.pallas_call(
        _linear_kernel,
        out_shape=jax.ShapeDtypeStruct((Mp, N), x2d.dtype),
        grid=(Mp // bm,),
        in_specs=[
            pl.BlockSpec((bm, K), lambda i: (i, 0)),
            pl.BlockSpec((K, N), lambda i: (0, 0)),
            pl.BlockSpec((1, N), lambda i: (0, 0)),
        ],
        out_specs=pl.BlockSpec((bm, N), lambda i: (i, 0)),
        compiler_params=_cparams(1),
    )(xp, w, b)
    return out[:M] if Mp != M else out


def _ff_kernel(x_ref, g1_ref, b1_ref, w1_ref, bb1_ref, w2_ref, bb2_ref,
               g2_ref, b2_ref, o_ref, *, eps, apply_final_ln):
    """Fused ConformerPositionwiseFeedForwardV1 + 0.5*residual (+ optional block final LN)."""
    x = x_ref[...].astype(F32)                                          # [bm, F]
    h = _ln(x, g1_ref[...], b1_ref[...], eps)
    a = jnp.dot(h.astype(BF16), w1_ref[...], preferred_element_type=jnp.float32) + bb1_ref[...]
    a = a * jax.nn.sigmoid(a)                                           # SiLU (f32)
    y = jnp.dot(a.astype(BF16), w2_ref[...], preferred_element_type=jnp.float32) + bb2_ref[...]
    y = 0.5 * y + x                                                     # scaled residual
    if apply_final_ln:
        y = _ln(y, g2_ref[...], b2_ref[...], eps)
    o_ref[...] = y.astype(o_ref.dtype)


def ff_module(x2d, p, final_ln=None, bm_max=512):
    M, F = x2d.shape
    FF = p["w1"].shape[1]
    bm = min(bm_max, _round_up(M, 8))
    xp, M, Mp = _pad_rows(x2d, bm)
    if final_ln is None:
        g2 = jnp.ones((1, F), F32)
        b2 = jnp.zeros((1, F), F32)
        apply_final_ln = False
    else:
        g2, b2 = final_ln
        apply_final_ln = True
    # TODO(synk): for F*FF weight slabs approaching the v7x VMEM budget, add a K-tiling
    #             grid axis over FF and/or single-buffer the constant-index weight specs.
    out = pl.pallas_call(
        functools.partial(_ff_kernel, eps=_EPS_LN, apply_final_ln=apply_final_ln),
        out_shape=jax.ShapeDtypeStruct((Mp, F), x2d.dtype),
        grid=(Mp // bm,),
        in_specs=[
            pl.BlockSpec((bm, F), lambda i: (i, 0)),
            pl.BlockSpec((1, F), lambda i: (0, 0)),
            pl.BlockSpec((1, F), lambda i: (0, 0)),
            pl.BlockSpec((F, FF), lambda i: (0, 0)),
            pl.BlockSpec((1, FF), lambda i: (0, 0)),
            pl.BlockSpec((FF, F), lambda i: (0, 0)),
            pl.BlockSpec((1, F), lambda i: (0, 0)),
            pl.BlockSpec((1, F), lambda i: (0, 0)),
            pl.BlockSpec((1, F), lambda i: (0, 0)),
        ],
        out_specs=pl.BlockSpec((bm, F), lambda i: (i, 0)),
        compiler_params=_cparams(1),
    )(xp, p["ln_g"], p["ln_b"], p["w1"], p["b1"], p["w2"], p["b2"], g2, b2)
    return out[:M] if Mp != M else out


def _conv_mhsa_kernel(x_ref, bias_ref,
                      cg_ref, cb_ref, wa_ref, ba_ref, wb_ref, bb_ref,
                      dw_ref, dwb_ref, bns_ref, bnb_ref, w2_ref, b2_ref,
                      mg_ref, mb_ref, wqkv_ref, bqkv_ref, wo_ref, bo_ref,
                      o_ref, qkv_ref, ctx_ref, *, K, H, Dh, scale, eps):
    """Fused ConformerConvolutionV1 + residual, then ConformerMHSAV1 + residual.

    One batch element per grid step; x_ref / o_ref are squeezed to [T, F].
    """
    T, F = x_ref.shape
    x = x_ref[...].astype(F32)                                          # [T, F]

    # ------------------------- Conv module -------------------------
    h = _ln(x, cg_ref[...], cb_ref[...], eps)
    hb = h.astype(BF16)
    a = jnp.dot(hb, wa_ref[...], preferred_element_type=jnp.float32) + ba_ref[...]
    gate = jnp.dot(hb, wb_ref[...], preferred_element_type=jnp.float32) + bb_ref[...]
    g = a * jax.nn.sigmoid(gate)                                        # GLU -> [T, F] f32

    # Depthwise conv over time via XLU rolls + row masks (same padding, circular wrap zeroed).
    pad = (K - 1) // 2
    row = lax.broadcasted_iota(jnp.int32, (T, F), 0)
    dw = dw_ref[...]                                                    # [K, F] f32
    acc = jnp.zeros_like(g)
    for k in range(K):                                                  # static tap loop
        sh = pad - k                                                    # y[t] += w[k]*g[t-sh]
        r = g if sh == 0 else pltpu.roll(g, shift=sh % T, axis=0)
        if sh > 0:
            r = jnp.where(row >= sh, r, 0.0)
        elif sh < 0:
            r = jnp.where(row < T + sh, r, 0.0)
        acc = acc + r * dw[k:k + 1, :]
    y = acc + dwb_ref[...]                                              # depthwise bias
    y = y * bns_ref[...] + bnb_ref[...]                                 # folded eval BatchNorm
    y = y * jax.nn.sigmoid(y)                                           # SiLU
    x2 = jnp.dot(y.astype(BF16), w2_ref[...],
                 preferred_element_type=jnp.float32) + b2_ref[...] + x  # pointwise2 + residual

    # ------------------------- MHSA module -------------------------
    bias = bias_ref[...]                                                # [1, T] key-padding bias
    h2 = _ln(x2, mg_ref[...], mb_ref[...], eps)
    qkv = jnp.dot(h2.astype(BF16), wqkv_ref[...],
                  preferred_element_type=jnp.float32) + bqkv_ref[...]   # [T, 3F] lane-dense
    qkv_ref[...] = qkv.astype(BF16)

    # Static head loop; per-head temporaries are staged through the ctx scratch so only
    # refs stay live across iterations (bounded live ranges without dynamic lane slicing).
    for hd in range(H):
        o0 = hd * Dh
        q = qkv_ref[:, o0:o0 + Dh]                                      # [T, Dh] bf16
        kh = qkv_ref[:, F + o0:F + o0 + Dh]
        vh = qkv_ref[:, 2 * F + o0:2 * F + o0 + Dh]
        sc = lax.dot_general(q, kh, (((1,), (1,)), ((), ())),
                             preferred_element_type=jnp.float32) * scale + bias   # [T, T]
        m = jnp.max(sc, axis=-1, keepdims=True)
        p = jnp.exp(sc - m)
        p = p * pl.reciprocal(jnp.sum(p, axis=-1, keepdims=True), approx=True)
        ctx = jnp.dot(p.astype(BF16), vh, preferred_element_type=jnp.float32)      # [T, Dh]
        ctx_ref[:, o0:o0 + Dh] = ctx.astype(BF16)

    out = jnp.dot(ctx_ref[...], wo_ref[...],
                  preferred_element_type=jnp.float32) + bo_ref[...] + x2           # out-proj + res
    o_ref[...] = out.astype(o_ref.dtype)


def conv_mhsa_module(x3, attn_bias, pc, pm, *, H, Kc):
    B, T, F = x3.shape
    Dh = F // H
    scale = 1.0 / (Dh ** 0.5)
    full = lambda shp: pl.BlockSpec(shp, lambda b: (0,) * len(shp))
    # TODO(synk): for long sequences, tile over (B, q-tiles) with online softmax so both
    #             v7x TensorCores share the time axis and scores never exceed VMEM.
    return pl.pallas_call(
        functools.partial(_conv_mhsa_kernel, K=Kc, H=H, Dh=Dh, scale=scale, eps=_EPS_LN),
        out_shape=jax.ShapeDtypeStruct((B, T, F), x3.dtype),
        grid=(B,),
        in_specs=[
            pl.BlockSpec((None, T, F), lambda b: (b, 0, 0)),   # x (leading dim squeezed)
            pl.BlockSpec((None, 1, T), lambda b: (b, 0, 0)),   # attention bias
            full((1, F)), full((1, F)),                        # conv LN gamma/beta
            full((F, F)), full((1, F)),                        # GLU value weights/bias
            full((F, F)), full((1, F)),                        # GLU gate weights/bias
            full((Kc, F)), full((1, F)),                       # depthwise weights/bias
            full((1, F)), full((1, F)),                        # folded BN scale/shift
            full((F, F)), full((1, F)),                        # pointwise2 weights/bias
            full((1, F)), full((1, F)),                        # MHSA LN gamma/beta
            full((F, 3 * F)), full((1, 3 * F)),                # packed QKV weights/bias
            full((F, F)), full((1, F)),                        # out-proj weights/bias
        ],
        out_specs=pl.BlockSpec((None, T, F), lambda b: (b, 0, 0)),
        scratch_shapes=[pltpu.VMEM((T, 3 * F), BF16),          # QKV staging
                        pltpu.VMEM((T, F), BF16)],             # per-head context staging
        compiler_params=_cparams(1),
    )(x3, attn_bias,
      pc["ln_g"], pc["ln_b"], pc["wa"], pc["ba"], pc["wb"], pc["bb"],
      pc["dw_w"], pc["dw_b"], pc["bn_scale"], pc["bn_shift"], pc["pw2_w"], pc["pw2_b"],
      pm["ln_g"], pm["ln_b"], pm["wqkv"], pm["bqkv"], pm["wo"], pm["bo"])


# --------------------------------------------------------------------------------------
# Conformer block / encoder
# --------------------------------------------------------------------------------------
def conformer_block(x2d, attn_bias, p, *, B, T, F, H, Kc):
    x2d = ff_module(x2d, p["ff1"])                                      # 0.5*FF1 + residual
    x3 = conv_mhsa_module(x2d.reshape(B, T, F), attn_bias,
                          p["conv"], p["mhsa"], H=H, Kc=Kc)             # Conv+res, MHSA+res
    x2d = ff_module(x3.reshape(B * T, F), p["ff2"],
                    final_ln=(p["final_ln"]["g"], p["final_ln"]["b"]))  # 0.5*FF2+res+final LN
    return x2d


def conformer_encoder(data, seq_mask, params, *, F, H, Kc):
    """data: [B, T', F_in] f32; seq_mask: [B, T'] bool (True = inside sequence)."""
    B, T_in, F_in = data.shape
    assert T_in % 4 == 0
    T = T_in // 4
    # Frontend stand-in: stack 4 consecutive frames (time downsample x4) + linear to model dim.
    x = data.reshape(B * T, 4 * F_in)
    x = linear(x, params["frontend"]["w"], params["frontend"]["b"])     # [B*T, F]
    mask = seq_mask[:, ::4]                                             # [B, T]
    attn_bias = jnp.where(mask, 0.0, -1e30).astype(F32).reshape(B, 1, T)
    for blk in params["blocks"]:
        x = conformer_block(x, attn_bias, blk, B=B, T=T, F=F, H=H, Kc=Kc)
    return x.reshape(B, T, F), mask


# --------------------------------------------------------------------------------------
# One-time parameter preparation (hoisted out of the forward pass)
# --------------------------------------------------------------------------------------
def prepare_params(raw):
    """Convert raw (PyTorch-layout-like, [in, out]) f32 params to kernel-ready layout:
    bf16 MXU weights, [1, N] f32 bias / LN vectors, pre-split GLU weights, pre-concatenated
    QKV projection, and eval BatchNorm folded to scale/shift.  Done once per checkpoint."""
    vec = lambda v: jnp.asarray(v, F32).reshape(1, -1)
    w16 = lambda w: jnp.asarray(w, BF16)

    def ff(p):
        return {"ln_g": vec(p["ln_g"]), "ln_b": vec(p["ln_b"]),
                "w1": w16(p["w1"]), "b1": vec(p["b1"]),
                "w2": w16(p["w2"]), "b2": vec(p["b2"])}

    prep = {"frontend": {"w": w16(raw["frontend"]["w"]), "b": vec(raw["frontend"]["b"])},
            "blocks": []}
    for blk in raw["blocks"]:
        c = blk["conv"]
        F = c["pw2_w"].shape[0]
        bn_scale = c["bn_gamma"] * jax.lax.rsqrt(c["bn_var"] + _EPS_BN)
        bn_shift = c["bn_beta"] - c["bn_mean"] * bn_scale
        conv = {"ln_g": vec(c["ln_g"]), "ln_b": vec(c["ln_b"]),
                "wa": w16(c["pw1_w"][:, :F]), "ba": vec(c["pw1_b"][:F]),
                "wb": w16(c["pw1_w"][:, F:]), "bb": vec(c["pw1_b"][F:]),
                "dw_w": jnp.asarray(c["dw_w"], F32), "dw_b": vec(c["dw_b"]),
                "bn_scale": vec(bn_scale), "bn_shift": vec(bn_shift),
                "pw2_w": w16(c["pw2_w"]), "pw2_b": vec(c["pw2_b"])}
        m = blk["mhsa"]
        mhsa = {"ln_g": vec(m["ln_g"]), "ln_b": vec(m["ln_b"]),
                "wqkv": w16(m["in_w"]), "bqkv": vec(m["in_b"]),
                "wo": w16(m["out_w"]), "bo": vec(m["out_b"])}
        prep["blocks"].append({
            "ff1": ff(blk["ff1"]), "ff2": ff(blk["ff2"]),
            "conv": conv, "mhsa": mhsa,
            "final_ln": {"g": vec(blk["final_ln"]["g"]), "b": vec(blk["final_ln"]["b"])},
        })
    return prep


# --------------------------------------------------------------------------------------
# Deterministic synthetic parameter initialization (raw, f32, [in, out] layout)
# --------------------------------------------------------------------------------------
def init_params(key, *, F_in, F, FF, Kc, num_layers):
    keys = iter(jax.random.split(key, 4 + 40 * num_layers))

    def w(shape, scale=0.02):
        return jax.random.normal(next(keys), shape, F32) * scale

    zeros = lambda n: jnp.zeros((n,), F32)
    ones = lambda n: jnp.ones((n,), F32)

    params = {"frontend": {"w": w((4 * F_in, F)), "b": zeros(F)}, "blocks": []}
    for _ in range(num_layers):
        def ff():
            return {"ln_g": ones(F), "ln_b": zeros(F),
                    "w1": w((F, FF)), "b1": zeros(FF),
                    "w2": w((FF, F)), "b2": zeros(F)}
        blk = {
            "ff1": ff(),
            "ff2": ff(),
            "conv": {"ln_g": ones(F), "ln_b": zeros(F),
                     "pw1_w": w((F, 2 * F)), "pw1_b": zeros(2 * F),
                     "dw_w": w((Kc, F)), "dw_b": zeros(F),
                     "bn_gamma": 1.0 + w((F,)), "bn_beta": w((F,)),
                     "bn_mean": zeros(F), "bn_var": ones(F),
                     "pw2_w": w((F, F)), "pw2_b": zeros(F)},
            "mhsa": {"ln_g": ones(F), "ln_b": zeros(F),
                     "in_w": w((F, 3 * F)), "in_b": zeros(3 * F),
                     "out_w": w((F, F)), "out_b": zeros(F)},
            "final_ln": {"g": ones(F), "b": zeros(F)},
        }
        params["blocks"].append(blk)
    return params


# --------------------------------------------------------------------------------------
if __name__ == "__main__":
    key = jax.random.PRNGKey(0)
    kp, kx = jax.random.split(key)

    # Small, shape-consistent config (lane-dense model dim): B=2, T'=32 (downsampled T=8),
    # F_in=40, model dim F=128, 4 heads (Dh=32), FF hidden 256, depthwise kernel 7, 2 layers.
    B, T_in, F_in = 2, 32, 40
    F, H, FF, Kc, L = 128, 4, 256, 7, 2

    raw_params = init_params(kp, F_in=F_in, F=F, FF=FF, Kc=Kc, num_layers=L)
    params = prepare_params(raw_params)     # one-time weight layout / bf16 / BN-fold prep

    data = jax.random.normal(kx, (B, T_in, F_in), F32)
    lengths = jnp.array([32, 24], jnp.int32)
    seq_mask = jnp.arange(T_in)[None, :] < lengths[:, None]   # True = inside sequence

    out, out_mask = conformer_encoder(data, seq_mask, params, F=F, H=H, Kc=Kc)
    out = jax.block_until_ready(out)
    out_mask = jax.block_until_ready(out_mask)

    assert out.shape == (B, T_in // 4, F), out.shape
    assert out_mask.shape == (B, T_in // 4), out_mask.shape
    assert bool(jnp.isfinite(out).all())
    print("KERNEL_OK")
</pallas_src>

<mosaic_0001>
module attributes {stable_mosaic.version = 11 : i64} {
  func.func @_linear_kernel(%arg0: i32, %arg1: memref<16x160xf32, #tpu.memory_space<vmem>>, %arg2: memref<160x128xbf16, #tpu.memory_space<vmem>>, %arg3: memref<1x128xf32, #tpu.memory_space<vmem>>, %arg4: memref<16x128xf32, #tpu.memory_space<vmem>>) attributes {dimension_semantics = [#tpu.dimension_semantics<parallel>], iteration_bounds = array<i64: 1>, scalar_prefetch = 0 : i64, scratch_operands = 0 : i64, tpu.core_type = #tpu.core_type<tc>, window_params = [{transform_indices = @transform_0, window_bounds = array<i64: 16, 160>}, {pipeline_mode = #tpu.pipeline_mode<synchronous>, transform_indices = @transform_1, window_bounds = array<i64: 160, 128>}, {pipeline_mode = #tpu.pipeline_mode<synchronous>, transform_indices = @transform_2, window_bounds = array<i64: 1, 128>}, {transform_indices = @transform_3, window_bounds = array<i64: 16, 128>}]} {
    %c0 = arith.constant 0 : index
    %c0_0 = arith.constant 0 : index
    %0 = vector.load %arg1[%c0, %c0_0] : memref<16x160xf32, #tpu.memory_space<vmem>>, vector<16x160xf32>
    %1 = arith.truncf %0 : vector<16x160xf32> to vector<16x160xbf16>
    %c0_1 = arith.constant 0 : index
    %c0_2 = arith.constant 0 : index
    %2 = vector.load %arg2[%c0_1, %c0_2] : memref<160x128xbf16, #tpu.memory_space<vmem>>, vector<160x128xbf16>
    %cst = arith.constant dense<0.000000e+00> : vector<16x128xf32>
    %3 = tpu.matmul %1, %2, %cst {dimension_numbers = #tpu.dot_dimension_numbers<[1], [0], [0], [1], [0, 0, 1, 1], [], []>} : vector<16x160xbf16>, vector<160x128xbf16>, vector<16x128xf32> -> vector<16x128xf32>
    %c0_3 = arith.constant 0 : index
    %c0_4 = arith.constant 0 : index
    %4 = vector.load %arg3[%c0_3, %c0_4] : memref<1x128xf32, #tpu.memory_space<vmem>>, vector<1x128xf32>
    %5 = vector.broadcast %4 : vector<1x128xf32> to vector<16x128xf32>
    %6 = arith.addf %3, %5 : vector<16x128xf32>
    %c0_5 = arith.constant 0 : index
    %c0_6 = arith.constant 0 : index
    %7 = vector.load %arg4[%c0_5, %c0_6] : memref<16x128xf32, #tpu.memory_space<vmem>>, vector<16x128xf32>
    tpu.vector_store %arg4[%c0_5, %c0_6], %6 {strides = array<i32>} : memref<16x128xf32, #tpu.memory_space<vmem>>, vector<16x128xf32>,
    return
  }
  func.func @transform_0(%arg0: i32) -> (i32, i32) {
    %c0_i32 = arith.constant 0 : i32
    %c0_i32_0 = arith.constant 0 : i32
    return %arg0, %c0_i32 : i32, i32
  }
  func.func @transform_1(%arg0: i32) -> (i32, i32) {
    %c0_i32 = arith.constant 0 : i32
    %c0_i32_0 = arith.constant 0 : i32
    %c0_i32_1 = arith.constant 0 : i32
    return %c0_i32, %c0_i32_0 : i32, i32
  }
  func.func @transform_2(%arg0: i32) -> (i32, i32) {
    %c0_i32 = arith.constant 0 : i32
    %c0_i32_0 = arith.constant 0 : i32
    %c0_i32_1 = arith.constant 0 : i32
    return %c0_i32, %c0_i32_0 : i32, i32
  }
  func.func @transform_3(%arg0: i32) -> (i32, i32) {
    %c0_i32 = arith.constant 0 : i32
    %c0_i32_0 = arith.constant 0 : i32
    return %arg0, %c0_i32 : i32, i32
  }
}

</mosaic_0001>

<bundles_post_ra>
// kernel: tpu_custom_call.1
= control target key start
LH: loop header
LB: loop body
LE: loop exit
PB: predicated region body
PF: predicated region fallthrough
CT: control target
= control target key end

     0   :  { %8 = vsyncpa [#allocation3], 0  ;;  %s372_s0 = inlined_call_operand.hbm [shape: f32[16,160], index: 0, kind: input, shape index: {}]   ;;  %s373_s1 = inlined_call_operand.hbm [shape: bf16[160,128], index: 1, kind: input, shape index: {}]   ;;  %s374_s2 = inlined_call_operand.vmem [shape: f32[1,128], index: 2, kind: input, shape index: {}]   ;;  %s375_s3 = inlined_call_operand.hbm [shape: f32[16,128], index: 3, kind: output, shape index: {}]  }
   0x1   :  { %9 = vsyncpa [#allocation6], 0 }
   0x2   :  { %10 = vsyncpa [#allocation4], 0  ;;  %s15_s14 = sshll.u32 %s372_s0, 4  ;;  %s331_s15 = smov [#allocation2]   ;;  %s16_s14 = int_to_ptr.hbm [resolvable:$true] %s15_s14 }
   0x3   :  { %s17_s16 = sshll.u32 %s331_s15, 4  ;;  %s28_s19 = sshll.u32 %s373_s1, 4  ;;  %s18_s16 = int_to_ptr.vmem [resolvable:$true] %s17_s16  ;;  %s29_s19 = int_to_ptr.hbm [resolvable:$true] %s28_s19 }
   0x4   :  { %s332_s20 = smov 256   ;;  %s333_s21 = smov 16  }
   0x5   :  { %23 = dma.hbm_to_vmem [thread:$0]  %s16_s14, 512, %s18_s16, [#allocation3], %s332_s20, %s332_s20, %s333_s21  }
   0x6   :  { %s334_s22 = smov [#allocation5]   ;;  %s335_s24 = smov 64  }
   0x7   :  { %s30_s23 = sshll.u32 %s334_s22, 4  ;;  %s336_s25 = smov 4   ;;  %s31_s23 = int_to_ptr.vmem [resolvable:$true] %s30_s23 }
   0x8   :  { %36 = dma.hbm_to_vmem [thread:$0]  %s29_s19, 1280, %s31_s23, [#allocation6], %s335_s24, %s335_s24, %s336_s25  }
   0x9   :  { %325 = dma.done.wait [#allocation3], 512  }
   0xa   :  { %326 = vsyncadd [#allocation3], 4294966784 }
   0xb   :  { %327 = dma.done.wait [#allocation6], 1280  }
   0xc   :  { %328 = vsyncadd [#allocation6], 4294966016  ;;  %v240_v0 = vld [vmem:[#allocation5 + $0x38] sm:$0xff]  ;;  %v242_v1 = vld [vmem:[#allocation5 + $0x48] sm:$0xff]  ;;  %vm138_vm0 = vcmask 261120   ;;  %s337_s26 = smov [#allocation7]  }
   0xd   :  { %142 = vmatpush.bf16.msra.mxu0 %v240_v0  ;;  %v239_v2 = vld [vmem:[#allocation5 + $0x30] sm:$0xff]  ;;  %162 = vmatpush.bf16.msra.mxu1 %v242_v1  ;;  %v241_v3 = vld [vmem:[#allocation5 + $0x40] sm:$0xff]  ;;  %v49_v4 = vld [vmem:[#allocation2 + $0x8] sm:$0xff]  ;;  %s176_s27 = sshll.u32 %s337_s26, 4  ;;  %s178_s30 = sshll.u32 %s375_s3, 4  ;;  %s177_s27 = int_to_ptr.vmem [resolvable:$true] %s176_s27  ;;  %s179_s30 = int_to_ptr.hbm [resolvable:$true] %s178_s30 }
   0xe   :  { %v51_v5 = vld [vmem:[#allocation2 + $0x18] sm:$0xff]  ;;  %v238_v6 = vld [vmem:[#allocation5 + $0x28] sm:$0xff]  ;;  %v237_v8 = vld [vmem:[#allocation5 + $0x20] sm:$0xff]  ;;  %s338_s4 = smov 128  }
   0xf   :  { %v53_v7 = vpack.c.bf16 %v51_v5, %v49_v4  ;;  %v236_v9 = vld [vmem:[#allocation5 + $0x18] sm:$0xff]  ;;  %v235_v10 = vld [vmem:[#allocation5 + $0x10] sm:$0xff]  ;;  %v234_v11 = vld [vmem:[#allocation5 + $0x8] sm:$0xff] }
  0x10   :  { %v233_v12 = vld [vmem:[#allocation5] sm:$0xff]  ;;  %v50_v14 = vld [vmem:[#allocation2 + $0x10] sm:$0xff] }
  0x11   :  { %143 = vmatpush.bf16.msra.mxu0 %v239_v2  ;;  %163 = vmatpush.bf16.msra.mxu1 %v241_v3  ;;  %v48_v13 = vld [vmem:[#allocation2] sm:$0xff] }
  0x12   :  { %v52_v15 = vpack.c.bf16 %v50_v14, %v48_v13  ;;  %v252_v16 = vld [vmem:[%s374_s2] ss:$0 sm:$0xff]  ;;  %s339_s2 = smov 8  }
  0x14   :  { %232 = vmatmul.msk.bf16.vlgmr.msra.gmra.mxu1 %vm138_vm0, %v53_v7 }
  0x15   :  { %144 = vmatpush.bf16.msra.mxu0 %v238_v6 }
  0x19   :  { %145 = vmatpush.bf16.msra.mxu0 %v237_v8 }
  0x1d   :  { %146 = vmatpush.bf16.msra.mxu0 %v236_v9 }
  0x21   :  { %147 = vmatpush.bf16.msra.mxu0 %v235_v10 }
  0x25   :  { %148 = vmatpush.bf16.msra.mxu0 %v234_v11 }
  0x29   :  { %149 = vmatpush.bf16.msra.mxu0 %v233_v12 }
  0x2c   :  { %150 = vmatmul.bf16.vlgmr.msra.gmra.mxu0 %v52_v15 }
  0x91   :  { %v165_v17 = vpop.f32.mrf.mxu1 }
  0x99   :  { %v167_v23 = vpop.f32.mrf.mxu1 }
  0xa9   :  { %v151_v18 = vpop.f32.mrf.mxu0 }
  0xaa   :  { %v152_v19 = vadd.f32 %v252_v16, %v151_v18 }
  0xac   :  { %v166_v20 = vadd.f32 %v165_v17, %v152_v19 }
  0xae   :  { %170 = vst [vmem:[#allocation7] sm:$0xff] %v166_v20 }
  0xb1   :  { %v153_v21 = vpop.f32.mrf.mxu0 }
  0xb2   :  { %v154_v22 = vadd.f32 %v252_v16, %v153_v21 }
  0xb4   :  { %v168_v24 = vadd.f32 %v167_v23, %v154_v22 }
  0xb6   :  { %171 = vst [vmem:[#allocation7 + $0x8] sm:$0xff] %v168_v24 }
  0xb7   :  { %184 = dma.vmem_to_hbm [thread:$0]  %s177_s27, 256, %s179_s30, [#allocation4], %s338_s4, %s338_s4, %s339_s2  }
  0xb8   :  { %329 = dma.done.wait [#allocation4], 256  }
  0xb9   :  { %330 = vsyncadd [#allocation4], 4294967040 }
  0xba   :  { %189 = vsyncpa [#allocation3], 1 }
  0xbb   :  { %190 = vsyncpa [#allocation6], 1 }
  0xbc   :  { %191 = vsyncpa [#allocation4], 1 }

</bundles_post_ra>
